<compile_context>
chip_gen: v7x
topology: tpu7x:2x2x1
jax: 0.10.0
libtpu: 0.0.40
codegen_flags: <defaults>
</compile_context>

<pallas_src>
import math

import jax
import jax.numpy as jnp
from jax.experimental import pallas as pl
from jax.experimental.pallas import tpu as pltpu


def _build_factor_tables(C, X, Y, Z, temperature, normalize, scale):
    """Angle-addition factor tables.

    Per lane l = g*C + c (g = dim-3 index, c = output channel):
        angle(i, j, l) = (i+1)*wz[l] + (j+1)*wy[l] + bias[l]   with
        bias[l] = (g+1)*wx[l] + phase[c]
    where wz/wy/wx are 1/dim_t gated by which coordinate block channel c lives
    in (normalization scale/(dim+eps) folded in) and phase is pi/2 for the
    'cos' half of each block (sin(v + pi/2) == cos(v)).

    Returns sinA, cosA of shape (X, 1, L) and sinB, cosB of shape (Y, L) with
        out[b,i,j,l] = sin(angle) = sinA[i,l]*cosB[j,l] + cosA[i,l]*sinB[j,l].
    """
    npf = C // 3
    # Channel blocks in output order: (pos_z, pos_y, pos_x) with their
    # (channel count, normalization extent).
    blocks = [(C - 2 * npf, X), (npf, Y), (npf, Z)]

    inv_rows, phase_rows, onehots = [], [], []
    for blk, (n, dim_size) in enumerate(blocks):
        d = jnp.arange(n, dtype=jnp.float32)
        dim_t = float(temperature) ** (2.0 * jnp.floor(d / 2.0) / max(n, 1))
        n_sin = (n + 1) // 2
        idx = jnp.concatenate(
            [2 * jnp.arange(n_sin), 2 * jnp.arange(n - n_sin) + 1])
        inv = 1.0 / dim_t[idx]
        if normalize:
            eps = 1e-05
            inv = inv * (scale / (dim_size + eps))
        phase = jnp.concatenate(
            [jnp.zeros((n_sin,), jnp.float32),
             jnp.full((n - n_sin,), math.pi / 2.0, jnp.float32)])
        onehot = jnp.zeros((3, n), jnp.float32).at[blk].set(1.0)
        inv_rows.append(inv)
        phase_rows.append(phase)
        onehots.append(onehot)

    inv_all = jnp.concatenate(inv_rows)                  # (C,)
    phase_all = jnp.concatenate(phase_rows)              # (C,)
    oh = jnp.concatenate(onehots, axis=1)                # (3, C): is_z, is_y, is_x

    wz = oh[0] * inv_all                                 # dim-1 (X) coordinate weight
    wy = oh[1] * inv_all                                 # dim-2 (Y) coordinate weight
    wx = oh[2] * inv_all                                 # dim-3 (Z) coordinate weight

    L = Z * C
    g = jnp.arange(Z, dtype=jnp.float32)[:, None]        # (Z, 1)
    wz_l = jnp.tile(wz, Z)                               # (L,)
    wy_l = jnp.tile(wy, Z)                               # (L,)
    bias_l = (wx[None, :] * (g + 1.0) + phase_all[None, :]).reshape(L)

    ii = jnp.arange(X, dtype=jnp.float32)[:, None]       # (X, 1)
    jj = jnp.arange(Y, dtype=jnp.float32)[:, None]       # (Y, 1)
    ang_a = (ii + 1.0) * wz_l[None, :]                   # (X, L)
    ang_b = (jj + 1.0) * wy_l[None, :] + bias_l[None, :]  # (Y, L)

    sin_a = jnp.sin(ang_a).reshape(X, 1, L).astype(jnp.float32)
    cos_a = jnp.cos(ang_a).reshape(X, 1, L).astype(jnp.float32)
    sin_b = jnp.sin(ang_b).astype(jnp.float32)
    cos_b = jnp.cos(ang_b).astype(jnp.float32)
    return sin_a, cos_a, sin_b, cos_b


def _pick_tile_y(B, X, Y, L, target_bytes=4 * 1024 * 1024):
    """Y-tile: multiple of 8 targeting ~4 MiB output blocks, or the full Y.
       Ragged last block is allowed (grid uses cdiv), so no giant fallback."""
    max_rows = max(8, target_bytes // (L * 4))
    tile_y = Y if Y <= max_rows else max((max_rows // 8) * 8, 8)
    # Keep >=2 grid steps so both v7x TensorCores get work even for B == X == 1.
    if B * X == 1 and Y >= 16:
        half = (Y + 1) // 2
        tile_y = min(tile_y, max(8, ((half + 7) // 8) * 8))
    return tile_y


def _pos_embed_kernel(sin_a_ref, cos_a_ref, sin_b_ref, cos_b_ref, o_ref):
    # sin_a_ref/cos_a_ref: (1, L); sin_b_ref/cos_b_ref: (tile_y, L); o_ref: (tile_y, L)
    # sin(A + B) = sin(A)cos(B) + cos(A)sin(B): 2 mul + 1 add per element.
    o_ref[...] = (sin_a_ref[...] * cos_b_ref[...]
                  + cos_a_ref[...] * sin_b_ref[...])


def position_embedding_sine_3d(x, temperature=10000, normalize=False, scale=None):
    """Pallas equivalent of PositionEmbeddingSine3D.forward.  x: (B, X, Y, Z, C)."""
    if scale is not None and not normalize:
        raise ValueError("normalize should be True if scale is passed")
    if scale is None:
        scale = 2 * math.pi

    B, X, Y, Z, C = x.shape
    L = Z * C  # lane-dense output width (full last dim -> legal, dense stores)

    sin_a, cos_a, sin_b, cos_b = _build_factor_tables(
        C, X, Y, Z, temperature, normalize, scale)

    tile_y = _pick_tile_y(B, X, Y, L)
    n_yt = pl.cdiv(Y, tile_y)
    grid = (n_yt, B, X)   # X innermost: B-tables stay resident across (B, X) sweep

    # VMEM budget: double-buffered output + sinB + cosB blocks + tiny A rows.
    blk_bytes = tile_y * L * 4
    vmem_need = 2 * (3 * blk_bytes + 2 * L * 4)
    vmem_limit = int(min(max(vmem_need + (4 << 20), 16 << 20), 48 << 20))

    total = B * X * Y * L
    cost = pl.CostEstimate(
        flops=3 * total,
        transcendentals=0,
        bytes_accessed=4 * total + 8 * (X + Y) * L)

    out = pl.pallas_call(
        _pos_embed_kernel,
        out_shape=jax.ShapeDtypeStruct((B, X, Y, L), jnp.float32),
        grid_spec=pltpu.PrefetchScalarGridSpec(
            num_scalar_prefetch=0,
            grid=grid,
            in_specs=[
                # Per-i factor rows, selected by the index_map (no in-kernel div/iota).
                pl.BlockSpec((None, 1, L), lambda jt, b, i: (i, 0, 0)),   # sinA
                pl.BlockSpec((None, 1, L), lambda jt, b, i: (i, 0, 0)),   # cosA
                # Per-j factor tiles; block index depends only on jt (outermost
                # grid axis) so they are DMA'd once per Y tile.
                pl.BlockSpec((tile_y, L), lambda jt, b, i: (jt, 0)),      # sinB
                pl.BlockSpec((tile_y, L), lambda jt, b, i: (jt, 0)),      # cosB
            ],
            out_specs=pl.BlockSpec(
                (None, None, tile_y, L), lambda jt, b, i: (b, i, jt, 0)),
        ),
        compiler_params=pltpu.CompilerParams(
            dimension_semantics=("parallel", "parallel", "parallel"),
            vmem_limit_bytes=vmem_limit),
        cost_estimate=cost,
    )(sin_a, cos_a, sin_b, cos_b)
    return out.reshape(B, X, Y, Z, C)


def _reference(x, temperature=10000, normalize=False, scale=None):
    """Pure-JAX transcription of the PyTorch forward (for verification)."""
    if scale is None:
        scale = 2 * math.pi
    B, X, Y, Z, C = x.shape
    npf = C // 3
    sizes = [npf, npf, C - 2 * npf]
    not_mask = jnp.ones((B, X, Y, Z), jnp.float32)
    z_embed = jnp.cumsum(not_mask, axis=1)
    y_embed = jnp.cumsum(not_mask, axis=2)
    x_embed = jnp.cumsum(not_mask, axis=3)
    if normalize:
        eps = 1e-05
        z_embed = z_embed / (z_embed[:, -1:, :, :] + eps) * scale
        y_embed = y_embed / (y_embed[:, :, -1:, :] + eps) * scale
        x_embed = x_embed / (x_embed[:, :, :, -1:] + eps) * scale

    def dim_t(n):
        d = jnp.arange(n, dtype=jnp.float32)
        return float(temperature) ** (2.0 * jnp.floor(d / 2.0) / n)

    def enc(embed, n):
        p = embed[..., None] / dim_t(n)
        return jnp.concatenate([jnp.sin(p[..., 0::2]), jnp.cos(p[..., 1::2])], axis=-1)

    pos_x = enc(x_embed, sizes[0])
    pos_y = enc(y_embed, sizes[1])
    pos_z = enc(z_embed, sizes[2])
    return jnp.concatenate([pos_z, pos_y, pos_x], axis=4)


if __name__ == "__main__":
    key = jax.random.PRNGKey(0)

    # Primary shape: (B, X, Y, Z, C) — only the shape matters for this embedding.
    B, X, Y, Z, C = 2, 4, 4, 8, 48
    x = jax.random.normal(key, (B, X, Y, Z, C), dtype=jnp.float32)

    pos = jax.block_until_ready(position_embedding_sine_3d(x))
    ref = _reference(x)
    assert pos.shape == (B, X, Y, Z, C)
    assert jnp.allclose(pos, ref, atol=1e-5, rtol=1e-5), "mismatch (default args)"

    # normalize=True path.
    pos_n = jax.block_until_ready(position_embedding_sine_3d(x, normalize=True))
    ref_n = _reference(x, normalize=True)
    assert jnp.allclose(pos_n, ref_n, atol=1e-5, rtol=1e-5), "mismatch (normalize)"

    # Odd (non-aligned) shape to exercise the generic layout path.
    B2, X2, Y2, Z2, C2 = 1, 3, 5, 4, 30
    x2 = jax.random.normal(key, (B2, X2, Y2, Z2, C2), dtype=jnp.float32)
    pos2 = jax.block_until_ready(position_embedding_sine_3d(x2))
    ref2 = _reference(x2)
    assert jnp.allclose(pos2, ref2, atol=1e-5, rtol=1e-5), "mismatch (odd shape)"

    print("KERNEL_OK")
</pallas_src>

<mosaic_0001>
module attributes {stable_mosaic.version = 11 : i64} {
  func.func @_pos_embed_kernel(%arg0: i32, %arg1: i32, %arg2: i32, %arg3: memref<1x1x384xf32, #tpu.memory_space<vmem>>, %arg4: memref<1x1x384xf32, #tpu.memory_space<vmem>>, %arg5: memref<4x384xf32, #tpu.memory_space<vmem>>, %arg6: memref<4x384xf32, #tpu.memory_space<vmem>>, %arg7: memref<1x1x4x384xf32, #tpu.memory_space<vmem>>) attributes {dimension_semantics = [#tpu.dimension_semantics<parallel>, #tpu.dimension_semantics<parallel>, #tpu.dimension_semantics<parallel>], iteration_bounds = array<i64: 1, 2, 4>, scalar_prefetch = 0 : i64, scratch_operands = 0 : i64, tpu.core_type = #tpu.core_type<tc>, window_params = [{transform_indices = @transform_0, window_bounds = array<i64: 1, 1, 384>}, {transform_indices = @transform_1, window_bounds = array<i64: 1, 1, 384>}, {transform_indices = @transform_2, window_bounds = array<i64: 4, 384>}, {transform_indices = @transform_3, window_bounds = array<i64: 4, 384>}, {transform_indices = @transform_4, window_bounds = array<i64: 1, 1, 4, 384>}]} {
    %c0 = arith.constant 0 : index
    %c0_0 = arith.constant 0 : index
    %c0_1 = arith.constant 0 : index
    %0 = vector.load %arg3[%c0, %c0_0, %c0_1] : memref<1x1x384xf32, #tpu.memory_space<vmem>>, vector<1x1x384xf32>
    %1 = vector.shape_cast %0 : vector<1x1x384xf32> to vector<1x384xf32>
    %c0_2 = arith.constant 0 : index
    %c0_3 = arith.constant 0 : index
    %2 = vector.load %arg6[%c0_2, %c0_3] : memref<4x384xf32, #tpu.memory_space<vmem>>, vector<4x384xf32>
    %3 = vector.broadcast %1 : vector<1x384xf32> to vector<4x384xf32>
    %4 = arith.mulf %3, %2 : vector<4x384xf32>
    %c0_4 = arith.constant 0 : index
    %c0_5 = arith.constant 0 : index
    %c0_6 = arith.constant 0 : index
    %5 = vector.load %arg4[%c0_4, %c0_5, %c0_6] : memref<1x1x384xf32, #tpu.memory_space<vmem>>, vector<1x1x384xf32>
    %6 = vector.shape_cast %5 : vector<1x1x384xf32> to vector<1x384xf32>
    %c0_7 = arith.constant 0 : index
    %c0_8 = arith.constant 0 : index
    %7 = vector.load %arg5[%c0_7, %c0_8] : memref<4x384xf32, #tpu.memory_space<vmem>>, vector<4x384xf32>
    %8 = vector.broadcast %6 : vector<1x384xf32> to vector<4x384xf32>
    %9 = arith.mulf %8, %7 : vector<4x384xf32>
    %10 = arith.addf %4, %9 : vector<4x384xf32>
    %c0_9 = arith.constant 0 : index
    %c0_10 = arith.constant 0 : index
    %c0_11 = arith.constant 0 : index
    %c0_12 = arith.constant 0 : index
    %11 = vector.load %arg7[%c0_9, %c0_10, %c0_11, %c0_12] : memref<1x1x4x384xf32, #tpu.memory_space<vmem>>, vector<1x1x4x384xf32>
    %12 = vector.shape_cast %11 : vector<1x1x4x384xf32> to vector<4x384xf32>
    %13 = vector.shape_cast %10 : vector<4x384xf32> to vector<1x1x4x384xf32>
    tpu.vector_store %arg7[%c0_9, %c0_10, %c0_11, %c0_12], %13 {strides = array<i32>} : memref<1x1x4x384xf32, #tpu.memory_space<vmem>>, vector<1x1x4x384xf32>,
    return
  }
  func.func @transform_0(%arg0: i32, %arg1: i32, %arg2: i32) -> (i32, i32, i32) {
    %c0_i32 = arith.constant 0 : i32
    %c0_i32_0 = arith.constant 0 : i32
    %c0_i32_1 = arith.constant 0 : i32
    return %arg2, %c0_i32, %c0_i32_0 : i32, i32, i32
  }
  func.func @transform_1(%arg0: i32, %arg1: i32, %arg2: i32) -> (i32, i32, i32) {
    %c0_i32 = arith.constant 0 : i32
    %c0_i32_0 = arith.constant 0 : i32
    %c0_i32_1 = arith.constant 0 : i32
    return %arg2, %c0_i32, %c0_i32_0 : i32, i32, i32
  }
  func.func @transform_2(%arg0: i32, %arg1: i32, %arg2: i32) -> (i32, i32) {
    %c0_i32 = arith.constant 0 : i32
    %c0_i32_0 = arith.constant 0 : i32
    return %arg0, %c0_i32 : i32, i32
  }
  func.func @transform_3(%arg0: i32, %arg1: i32, %arg2: i32) -> (i32, i32) {
    %c0_i32 = arith.constant 0 : i32
    %c0_i32_0 = arith.constant 0 : i32
    return %arg0, %c0_i32 : i32, i32
  }
  func.func @transform_4(%arg0: i32, %arg1: i32, %arg2: i32) -> (i32, i32, i32, i32) {
    %c0_i32 = arith.constant 0 : i32
    %c0_i32_0 = arith.constant 0 : i32
    return %arg1, %arg2, %arg0, %c0_i32 : i32, i32, i32, i32
  }
}

</mosaic_0001>

<bundles_post_ra>
// kernel: tpu_custom_call.1
= control target key start
LH: loop header
LB: loop body
LE: loop exit
PB: predicated region body
PF: predicated region fallthrough
CT: control target
= control target key end

     0   :  { %s1290_s0 = inlined_call_operand.hbm [shape: f32[4,1,384], index: 0, kind: input, shape index: {}]   ;;  %s1291_s1 = inlined_call_operand.hbm [shape: f32[4,1,384], index: 1, kind: input, shape index: {}]   ;;  %s1292_s2 = inlined_call_operand.hbm [shape: f32[4,384], index: 2, kind: input, shape index: {}]   ;;  %s1293_s3 = inlined_call_operand.hbm [shape: f32[4,384], index: 3, kind: input, shape index: {}]   ;;  %s1294_s4 = inlined_call_operand.hbm [shape: f32[2,4,4,384], index: 4, kind: output, shape index: {}]  }
   0x1   :  { %1304 = sst [smem:[#allocation20_spill]] %s1290_s0 }
   0x2   :  { %1305 = sst [smem:[#allocation21_spill]] %s1292_s2 }
   0x3   :  { %1306 = sst [smem:[#allocation22_spill]] %s1293_s3 }
   0x4   :  { %9 = vsyncpa [#allocation3], 0 }
   0x5   :  { %11 = vsyncpa [#allocation3 + $0x1], 0 }
   0x6   :  { %12 = vsyncpa [#allocation6], 0 }
   0x7   :  { %14 = vsyncpa [#allocation6 + $0x1], 0 }
   0x8   :  { %15 = vsyncpa [#allocation9], 0 }
   0x9   :  { %16 = vsyncpa [#allocation4], 0 }
   0xa   :  { %18 = vsyncpa [#allocation4 + $0x1], 0  ;;  %s963_s15 = smov 0   ;;  %s965_s16 = smov 0  }
   0xb   :  { %s967_s17 = smov 0   ;;  %s969_s18 = smov 0  }
   0xc   :  { %s971_s19 = smov 0   ;;  %s973_s20 = smov 0  }
   0xd   :  { %s975_s21 = smov 0   ;;  %s977_s22 = smov 0  }
   0xe   :  { %s979_s23 = smov 0   ;;  %s981_s24 = smov 0  }
   0xf   :  { %s983_s25 = smov 0  }
  0x10 LB: > { %1307 = sst [smem:[#allocation16_spill]] %s927_s24  ;;  %s1017_s26 = sadd.s32 4294967295, %s931_s25   ;;  %s931_s25 = sphi %s983_s25, %s24_s25   ;;  %s927_s24 = sphi %s981_s24, %s1333_s24   ;;  %s923_s23 = sphi %s979_s23, %s1341_s23   ;;  %s919_s22 = sphi %s977_s22, %s1331_s22   ;;  %s915_s21 = sphi %s975_s21, %s1340_s21   ;;  %s911_s20 = sphi %s973_s20, %s1339_s20   ;;  %s907_s19 = sphi %s971_s19, %s1338_s19   ;;  %s903_s18 = sphi %s969_s18, %s1337_s18   ;;  %s899_s17 = sphi %s967_s17, %s1336_s17   ;;  %s895_s16 = sphi %s965_s16, %s1335_s16   ;;  %s891_s15 = sphi %s963_s15, %s1334_s15  }
  0x11   : > { %s530_s27 = sadd.s32 4294967294, %s931_s25   ;;  %p63_p0 = scmp.ne.s32.totalorder %s907_s19, %s903_s18 }
  0x12   : > { %p1295_p1 = scmp.eq.s32.totalorder %s1017_s26, 0  ;;  %p168_p2 = scmp.ne.s32.totalorder %s899_s17, %s895_s16 }
  0x13   : > { %p169_p3 = scmp.eq.s32.totalorder %s1017_s26, 7  ;;  %p174_p5 = scmp.ne.s32.totalorder %s895_s16, %s891_s15 }
  0x14   : > { %p1027_p4 = por %p1295_p1, %p63_p0  ;;  %p175_p7 = scmp.eq.s32.totalorder %s530_s27, 7 }
  0x15   : > { %p1033_p6 = por %p169_p3, %p168_p2  ;;  %p531_p8 = scmp.ge.s32.totalorder %s931_s25, 1 }
  0x16   : > { %s1308_s28 = scalar_select %p1027_p4, 1, 0 }
  0x17   : > { %s1309_s29 = scalar_select %p1033_p6, 1, 0 }
  0x18   : > { %p182_p9 = scmp.lt.s32.totalorder %s931_s25, 9  ;;  %p1039_p10 = por %p175_p7, %p174_p5 }
  0x19   : > { %s933_s6 = smov [#allocation7]   ;;  %s934_s9 = smov [#allocation8]  }
  0x1a   : > { %s1310_s30 = scalar_select %p1039_p10, 1, 0 }
  0x1b   : > { %p1043_p11 = pnand %p531_p8, %p182_p9  ;;  %s198_s7 = sshll.u32 %s933_s6, 4  ;;  %s199_s7 = int_to_ptr.vmem [resolvable:$true] %s198_s7 }
  0x1c   : > { %1311 = sst [smem:[#allocation17_spill]] %s1310_s30  ;;  %s212_s10 = sshll.u32 %s934_s9, 4  ;;  %s1055_s10 = int_to_ptr.vmem [resolvable:$true] %s212_s10 }
  0x1d   : > { %s1312_s5 = scalar_select %p1043_p11, 1, 0 }
  0x1e   : > { %p565_p12 = pneg %p1043_p11  ;;  %s1314_s2 = sld [smem:[#allocation21_spill]] }
  0x20   : > { %p1051_p13 = pnand %p565_p12, %p1295_p1 }
  0x22   : > { %p683_p2 = pneg %p1051_p13 }
  0x24   : > { %s681_s13 = scalar_lea.hbm %s1314_s2, 192 }
  0x25   : > { %p682_p0 = scmp.ne.s32.totalorder %s1314_s2, %s681_s13  ;;  %p688_p7 = scmp.lt.u32.totalorder %s681_s13, %s1314_s2 }
  0x27   : > { %p684_p3 = pnand %p683_p2, %p682_p0 }
  0x29   : > { %p685_p5 = pneg %p684_p3 }
  0x2b   : > { %p690_p8 = pnand %p688_p7, %p685_p5 }
  0x2d   : > { %693 = shalt.err (!%p690_p8)
}
  0x2e   : > { %s694_s9 = scalar_lea.vmem %s199_s7, 192  ;;  %p702_p10 = scmp.lt.s32.totalorder %s199_s7, %s199_s7 }
  0x2f   : > { %p695_p9 = scmp.ne.s32.totalorder %s199_s7, %s694_s9  ;;  %p703_p6 = scmp.lt.s32.totalorder %s694_s9, %s694_s9 }
  0x31   : > { %p697_p12 = pnand %p695_p9, %p683_p2  ;;  %p704_p4 = por %p703_p6, %p702_p10 }
  0x33   : > { %p698_p1 = pneg %p697_p12 }
  0x35   : > { %p705_p11 = pnand %p704_p4, %p698_p1 }
  0x37   : > { %708 = shalt.err (!%p705_p11)
}
  0x38   : > { %568 = dma.hbm_to_vmem [thread:$0]  (!%p1051_p13), %s1314_s2, 192, %s199_s7, [#allocation6]  }
  0x39   : > { %s1315_s3 = sld [smem:[#allocation22_spill]] }
  0x3f   : > { %s709_s18 = scalar_lea.hbm %s1315_s3, 192 }
  0x40   : > { %p710_p0 = scmp.ne.s32.totalorder %s1315_s3, %s709_s18  ;;  %p716_p4 = scmp.lt.u32.totalorder %s709_s18, %s1315_s3 }
  0x42   : > { %p712_p6 = pnand %p710_p0, %p683_p2 }
  0x44   : > { %p713_p1 = pneg %p712_p6 }
  0x46   : > { %p718_p10 = pnand %p716_p4, %p713_p1 }
  0x48   : > { %721 = shalt.err (!%p718_p10)
}
  0x49   : > { %s722_s7 = scalar_lea.vmem %s1055_s10, 192  ;;  %p730_p7 = scmp.lt.s32.totalorder %s1055_s10, %s1055_s10 }
  0x4a   : > { %p723_p11 = scmp.ne.s32.totalorder %s1055_s10, %s722_s7  ;;  %p731_p8 = scmp.lt.s32.totalorder %s722_s7, %s722_s7 }
  0x4c   : > { %p725_p3 = pnand %p723_p11, %p683_p2  ;;  %p732_p9 = por %p731_p8, %p730_p7 }
  0x4e   : > { %p726_p5 = pneg %p725_p3 }
  0x50   : > { %p733_p12 = pnand %p732_p9, %p726_p5 }
  0x52   : > { %736 = shalt.err (!%p733_p12)
}
  0x53   : > { %571 = dma.hbm_to_vmem [thread:$0]  (!%p1051_p13), %s1315_s3, 192, %s1055_s10, [#allocation9]  }
  0x54   : > { %s36_s12 = sadd.s32 1, %s923_s23  ;;  %s39_s8 = sadd.s32 1, %s927_s24 }
  0x55   : > { %p37_p2 = scmp.ge.s32.totalorder %s36_s12, 4  ;;  %s50_s13 = sadd.s32 1, %s911_s20 }
  0x56   : > { %p57_p0 = scmp.ne.s32.totalorder %s911_s20, %s907_s19  ;;  %p58_p6 = scmp.eq.s32.totalorder %s931_s25, 0 }
  0x57   : > { %s1343_s12 = smov (%p37_p2, %s36_s12), 0  ;;  %s1345_s8 = smov (!%p37_p2, %s39_s8), %s927_s24 }
  0x58   : > { %1316 = sst [smem:[#allocation18_spill]] %s1343_s12  ;;  %s47_s14 = ssub.s32 %s923_s23, %s1343_s12 }
  0x59   : > { %p41_p1 = scmp.ge.s32.totalorder %s1345_s8, 2  ;;  %p48_p4 = scmp.eq.s32.totalorder %s47_s14, 0 }
  0x5a   : > { %p59_p13 = por %p58_p6, %p57_p0  ;;  %s158_s10 = sadd.s32 1, %s899_s17 }
  0x5b   : > { %s1347_s8 = smov (%p41_p1, %s1345_s8), 0  ;;  %p585_p10 = scmp.lt.s32.totalorder %s931_s25, 8 }
  0x5c   : > { %1317 = sst [smem:[#allocation19_spill]] %s1347_s8  ;;  %s151_s27 = ssub.s32 %s927_s24, %s1347_s8 }
  0x5d   : > { %s1119_s18 = scalar_select %p48_p4, %s911_s20, %s50_s13  }
  0x5e   : > { %s153_s6 = sor.u32 %s151_s27, %s47_s14  ;;  %s223_s9 = sand.u32 1, %s911_s20  }
  0x5f   : > { %p156_p11 = scmp.eq.s32.totalorder %s153_s6, 0  ;;  %s1125_s7 = smul.u32 3, %s223_s9 }
  0x60   : > { %p1127_p3 = pnand %p585_p10, %p59_p13  ;;  %s1302_s2 = smul.u32 48, %s923_s23 }
  0x61   : > { %s1132_s11 = scalar_select %p156_p11, %s899_s17, %s158_s10  }
  0x62   : > { %s227_s3 = scalar_lea.vmem [#allocation2], %s1125_s7  ;;  %s1319_s0 = sld [smem:[#allocation20_spill]] }
  0x63   : > { %s235_s13 = sshll.u32 %s227_s3, 4  ;;  %s224_s27 = scalar_lea.sflag [#allocation3], %s223_s9  ;;  %s1143_s13 = int_to_ptr.vmem [resolvable:$true] %s235_s13 }
  0x64   : > { %p739_p7 = pneg %p1127_p3 }
  0x68   : > { %s1141_s14 = scalar_lea.hbm %s1319_s0, %s1302_s2  ;;  %s742_s12 = scalar_lea.hbm %s1319_s0, 192 }
  0x69   : > { %s737_s6 = scalar_lea.hbm %s1141_s14, 48  ;;  %p743_p12 = scmp.lt.u32.totalorder %s1141_s14, %s1319_s0 }
  0x6a   : > { %p738_p5 = scmp.ne.s32.totalorder %s1141_s14, %s737_s6  ;;  %p744_p2 = scmp.lt.u32.totalorder %s742_s12, %s737_s6 }
  0x6b   : > { %p746_p6 = scmp.lt.u32.totalorder %s737_s6, %s1141_s14 }
  0x6c   : > { %p740_p8 = pnand %p739_p7, %p738_p5  ;;  %p745_p0 = por %p744_p2, %p743_p12 }
  0x6e   : > { %p741_p9 = pneg %p740_p8  ;;  %p747_p1 = por %p746_p6, %p745_p0 }
  0x70   : > { %p748_p4 = pnand %p747_p1, %p741_p9 }
  0x72   : > { %751 = shalt.err (!%p748_p4)
}
  0x73   : > { %s752_s9 = scalar_lea.vmem %s1143_s13, 48  ;;  %s935_s3 = smov [#allocation2]  }
  0x74   : > { %p753_p13 = scmp.ne.s32.totalorder %s1143_s13, %s752_s9  ;;  %s757_s10 = sshll.u32 %s935_s3, 4  ;;  %s758_s10 = int_to_ptr.vmem [resolvable:$false] %s757_s10 }
  0x75   : > { %s759_s2 = scalar_lea.vmem %s758_s10, 96  ;;  %p760_p5 = scmp.lt.s32.totalorder %s1143_s13, %s758_s10 }
  0x76   : > { %p755_p10 = pnand %p753_p13, %p739_p7  ;;  %p761_p8 = scmp.lt.s32.totalorder %s759_s2, %s752_s9 }
  0x78   : > { %p756_p11 = pneg %p755_p10  ;;  %p762_p12 = por %p761_p8, %p760_p5 }
  0x7a   : > { %p763_p2 = pnand %p762_p12, %p756_p11 }
  0x7c   : > { %766 = shalt.err (!%p763_p2)
}
  0x7d   : > { %575 = dma.hbm_to_vmem [thread:$0]  (!%p1127_p3), %s1141_s14, 48, %s1143_s13, %s224_s27  }
  0x7e   : > { %s242_s6 = sand.u32 1, %s931_s25   ;;  %s1320_s12 = smul.u32 48, %s923_s23 }
  0x7f   : > { %s246_s9 = scalar_lea.vmem [#allocation5], %s1125_s7  ;;  %s243_s2 = scalar_lea.sflag [#allocation6], %s242_s6 }
  0x80   : > { %s1176_s0 = scalar_lea.hbm %s1291_s1, %s1320_s12  ;;  %s254_s10 = sshll.u32 %s246_s9, 4  ;;  %s255_s10 = int_to_ptr.vmem [resolvable:$true] %s254_s10 }
  0x81   : > { %s767_s24 = scalar_lea.hbm %s1176_s0, 48  ;;  %s772_s27 = scalar_lea.hbm %s1291_s1, 192 }
  0x82   : > { %p768_p9 = scmp.ne.s32.totalorder %s1176_s0, %s767_s24  ;;  %p773_p1 = scmp.lt.u32.totalorder %s1176_s0, %s1291_s1 }
  0x83   : > { %p774_p4 = scmp.lt.u32.totalorder %s772_s27, %s767_s24  ;;  %p776_p10 = scmp.lt.u32.totalorder %s767_s24, %s1176_s0 }
  0x84   : > { %p770_p0 = pnand %p768_p9, %p739_p7 }
  0x85   : > { %p775_p13 = por %p774_p4, %p773_p1 }
  0x86   : > { %p771_p6 = pneg %p770_p0 }
  0x87   : > { %p777_p11 = por %p776_p10, %p775_p13 }
  0x89   : > { %p778_p5 = pnand %p777_p11, %p771_p6 }
  0x8b   : > { %781 = shalt.err (!%p778_p5)
}
  0x8c   : > { %s782_s7 = scalar_lea.vmem %s255_s10, 48  ;;  %s936_s6 = smov [#allocation5]  }
  0x8d   : > { %p783_p8 = scmp.ne.s32.totalorder %s255_s10, %s782_s7  ;;  %s787_s3 = sshll.u32 %s936_s6, 4  ;;  %s788_s3 = int_to_ptr.vmem [resolvable:$false] %s787_s3 }
  0x8e   : > { %s789_s9 = scalar_lea.vmem %s788_s3, 96  ;;  %p790_p9 = scmp.lt.s32.totalorder %s255_s10, %s788_s3 }
  0x8f   : > { %p785_p12 = pnand %p783_p8, %p739_p7  ;;  %p791_p0 = scmp.lt.s32.totalorder %s789_s9, %s782_s7 }
  0x91   : > { %p786_p2 = pneg %p785_p12  ;;  %p792_p1 = por %p791_p0, %p790_p9 }
  0x93   : > { %p793_p4 = pnand %p792_p1, %p786_p2 }
  0x95   : > { %796 = shalt.err (!%p793_p4)
}
  0x96   : > { %578 = dma.hbm_to_vmem [thread:$0]  (!%p1127_p3), %s1176_s0, 48, %s255_s10, %s243_s2  }
  0x97   : > { %p1321_p6 = scmp.ne.s32.totalorder %s1312_s5, 0 }
  0x98   : > { %s265_s24 = sand.u32 (!%p1321_p6), 1, %s907_s19   ;;  %p1322_p7 = scmp.ne.s32.totalorder (!%p1321_p6), %s1308_s28, 0 }
  0x99   : > { %263 = sbr.rel (%p1321_p6) target bundleno = 199 (0xc7), region = 36  ;;  %s266_s14 = scalar_lea.sflag (!%p1321_p6), [#allocation3], %s265_s24 }
  0x9a   : > { %s547_s13 = smul.u32 (!%p1321_p6), 3, %s265_s24 }
  0x9c   : > { %s269_s27 = scalar_lea.vmem (!%p1321_p6), [#allocation2], %s547_s13 }
  0xa0   : > { %870 = dma.done.wait (%p1322_p7), %s266_s14, 48  }
  0xa1   : > { %872 = vsyncadd (%p1322_p7), %s266_s14, 4294967248  ;;  %s274_s12 = sand.u32 1, %s1017_s26   ;;  %s278_s8 = scalar_lea.vmem [#allocation5], %s547_s13 }
  0xa2   : > { %s275_s30 = scalar_lea.sflag [#allocation6], %s274_s12 }
  0xa3   : > { %874 = dma.done.wait (%p1322_p7), %s275_s30, 48  }
  0xa4   : > { %876 = vsyncadd (%p1322_p7), %s275_s30, 4294967248  ;;  %p1323_p3 = scmp.eq.s32.totalorder %s1017_s26, 0 }
  0xa6   : > { %878 = dma.done.wait (%p1323_p3), [#allocation6], 192   ;;  %p1324_p13 = pmov %p1323_p3 }
  0xa7   : > { %p1325_p10 = pmov %p1323_p3 }
  0xa8   : > { %880 = vsyncadd (%p1324_p13), [#allocation6], 4294967104 }
  0xa9   : > { %882 = dma.done.wait (%p1325_p10), [#allocation9], 192   ;;  %p1326_p11 = pmov %p1323_p3 }
  0xaa   : > { %v320_v0 = vlaneseq  ;;  %s313_s0 = sand.u32 1, %s895_s16   ;;  %s549_s28 = smul.u32 3, %s915_s21  ;;  %v316_v5 = vld [vmem:[%s269_s27] sm:$0x7]  ;;  %v317_v6 = vld [vmem:[#allocation8] sm:$0xff]  ;;  %v342_v11 = vld [vmem:[#allocation7] sm:$0xff] }
  0xab   : > { %884 = vsyncadd (%p1326_p11), [#allocation9], 4294967104  ;;  %s548_s5 = smul.u32 12, %s313_s0  ;;  %v341_v7 = vld [vmem:[%s278_s8] sm:$0x7]  ;;  %v336_v10 = vcombine.high %v317_v6, %v317_v6  ;;  %v361_v16 = vcombine.high %v342_v11, %v342_v11  ;;  %s376_s9 = scalar_lea.sflag [#allocation4], %s313_s0 }
  0xac   : > { %v321_v1 = vshrl.u32 %v320_v0, 7  ;;  %s550_s10 = smul.u32 12, %s919_s22  ;;  %v318_v13 = vld [vmem:[#allocation8 + $0x8] sm:$0xf]  ;;  %v343_v14 = vld [vmem:[#allocation7 + $0x8] sm:$0xf] }
  0xad   : > { %s315_s22 = scalar_lea.vmem [#allocation10], %s548_s5  ;;  %p1327_p8 = scmp.ne.s32.totalorder %s1309_s29, 0 }
  0xae   : > { %v322_v2 = vsub.s32 0, %v321_v1  ;;  %v326_v3 = vsub.s32 1, %v321_v1  ;;  %v330_v4 = vsub.s32 2, %v321_v1  ;;  %s390_s21 = sadd.s32 %s550_s10, %s549_s28  ;;  %s394_s26 = sshll.u32 %s315_s22, 4  ;;  %s1223_s26 = int_to_ptr.vmem [resolvable:$true] %s394_s26 }
  0xaf   : > { %s540_s2 = sshll.u32 %s390_s21, 6  ;;  %s797_s24 = scalar_lea.vmem %s1223_s26, 192 }
  0xb0   : > { %v323_v8 = vrot.slane %v316_v5, %v322_v2  ;;  %v327_v9 = vrot.slane %v316_v5, %v326_v3  ;;  %v348_v12 = vrot.slane %v341_v7, %v322_v2  ;;  %v352_v15 = vrot.slane %v341_v7, %v326_v3  ;;  %s1228_s3 = scalar_lea.hbm %s1294_s4, %s540_s2  ;;  %p798_p5 = scmp.ne.s32.totalorder %s1223_s26, %s797_s24 }
  0xb1   : > { %v331_v17 = vrot.slane %v316_v5, %v330_v4  ;;  %v356_v18 = vrot.slane %v341_v7, %v330_v4  ;;  %s937_s13 = smov [#allocation10]  }
  0xb2   : > { %v338_v19 = vmul.f32 %v323_v8, %v317_v6  ;;  %v339_v20 = vmul.f32 %v336_v10, %v327_v9  ;;  %v363_v21 = vmul.f32 %v348_v12, %v342_v11  ;;  %v364_v22 = vmul.f32 %v361_v16, %v352_v15  ;;  %p799_p12 = pnand %p798_p5, %p1327_p8  ;;  %s801_s14 = sshll.u32 %s937_s13, 4  ;;  %s802_s14 = int_to_ptr.vmem [resolvable:$false] %s801_s14 }
  0xb3   : > { %v340_v23 = vmul.f32 %v331_v17, %v318_v13  ;;  %v365_v24 = vmul.f32 %v356_v18, %v343_v14  ;;  %s803_s27 = scalar_lea.vmem %s802_s14, 384  ;;  %p804_p9 = scmp.lt.s32.totalorder %s1223_s26, %s802_s14 }
  0xb4   : > { %v366_v25 = vadd.f32 %v363_v21, %v338_v19  ;;  %v367_v26 = vadd.f32 %v364_v22, %v339_v20  ;;  %p800_p2 = pneg %p799_p12  ;;  %p805_p0 = scmp.lt.s32.totalorder %s803_s27, %s797_s24 }
  0xb5   : > { %v368_v27 = vadd.f32 %v365_v24, %v340_v23 }
  0xb6   : > { %v371_v28 = vcombine.low %v366_v25, %v367_v26  ;;  %p806_p1 = por %p805_p0, %p804_p9 }
  0xb7   : > { %374 = vst [vmem:[%s315_s22 + $0x8] sm:$0xf] %v368_v27 }
  0xb8   : > { %373 = vst [vmem:[%s315_s22] sm:$0xff] %v371_v28  ;;  %p807_p4 = pnand %p806_p1, %p800_p2 }
  0xba   : > { %810 = shalt.err (!%p807_p4)
}
  0xbb   : > { %s811_s12 = scalar_lea.hbm %s1228_s3, 192  ;;  %s815_s0 = scalar_lea.hbm %s1294_s4, 1536 }
  0xbc   : > { %p812_p6 = scmp.ne.s32.totalorder %s1228_s3, %s811_s12  ;;  %p816_p13 = scmp.lt.u32.totalorder %s1228_s3, %s1294_s4 }
  0xbd   : > { %p817_p10 = scmp.lt.u32.totalorder %s815_s0, %s811_s12  ;;  %p819_p5 = scmp.lt.u32.totalorder %s811_s12, %s1228_s3 }
  0xbe   : > { %p813_p7 = pnand %p812_p6, %p1327_p8 }
  0xbf   : > { %p818_p11 = por %p817_p10, %p816_p13 }
  0xc0   : > { %p814_p3 = pneg %p813_p7 }
  0xc1   : > { %p820_p12 = por %p819_p5, %p818_p11 }
  0xc3   : > { %p821_p2 = pnand %p820_p12, %p814_p3 }
  0xc5   : > { %824 = shalt.err (!%p821_p2)
}
  0xc6   : > { %563 = dma.vmem_to_hbm [thread:$0]  (%p1327_p8), %s1223_s26, 192, %s1228_s3, %s376_s9  }
  0xc7 PF: > { %s1328_s10 = sld [smem:[#allocation17_spill]]  ;;  %p588_p9 = scmp.ge.s32.totalorder %s931_s25, 2 }
  0xc8   : > { %s406_s21 = sand.u32 1, %s891_s15  }
  0xc9   : > { %s407_s22 = scalar_lea.sflag [#allocation4], %s406_s21 }
  0xcd   : > { %p1329_p0 = scmp.ne.s32.totalorder %s1328_s10, 0 }
  0xcf   : > { %p580_p1 = pnand %p588_p9, %p1329_p0 }
  0xd1   : > { %886 = dma.done.wait (!%p580_p1), %s407_s22, 192  }
  0xd2   : > { %888 = vsyncadd (!%p580_p1), %s407_s22, 4294967104  ;;  %s24_s25 = sadd.s32 1, %s931_s25   ;;  %s1330_s29 = smov %s1119_s18 }
  0xd3   : > { %p21_p4 = scmp.ge.s32.totalorder %s24_s25, 10   ;;  %s1331_s22 = sld [smem:[#allocation16_spill]] }
  0xd4   : > { %s1332_s26 = sld [smem:[#allocation18_spill]]  ;;  %s1333_s24 = sld [smem:[#allocation19_spill]] }
  0xd5   : > { %s1334_s15 = smov %s895_s16  ;;  %s1335_s16 = smov %s899_s17 }
  0xd6   : > { %s1336_s17 = smov %s1132_s11  ;;  %s1337_s18 = smov %s907_s19 }
  0xd7   : > { %s1338_s19 = smov %s911_s20  ;;  %s1339_s20 = smov %s1330_s29 }
  0xd8   : > { %s1340_s21 = smov %s923_s23  ;;  %23 = sbr.rel (!%p21_p4) target bundleno = 16 (0x10), region = 104 }
  0xda   : > { %s1341_s23 = smov %s1332_s26 }
  0xdf   :  { %412 = vsyncpa [#allocation3], 1 }
  0xe0   :  { %414 = vsyncpa [#allocation3 + $0x1], 1 }
  0xe1   :  { %415 = vsyncpa [#allocation6], 1 }
  0xe2   :  { %417 = vsyncpa [#allocation6 + $0x1], 1 }
  0xe3   :  { %418 = vsyncpa [#allocation9], 1 }
  0xe4   :  { %419 = vsyncpa [#allocation4], 1 }
  0xe5   :  { %421 = vsyncpa [#allocation4 + $0x1], 1 }

</bundles_post_ra>
